<compile_context>
chip_gen: v6e
topology: v6e:2x2x1
jax: 0.10.0
libtpu: 0.0.40
codegen_flags: <defaults>
</compile_context>

<pallas_src>
import math

import jax
import jax.numpy as jnp
from jax.experimental import pallas as pl
from jax.experimental.pallas import tpu as pltpu


# --------------------------------- kernels -----------------------------------

def _noisy_linear_kernel(x_ref, wmu_ref, wsig_ref, ein_ref, eout_ref,
                         bmu_ref, bsig_ref, beps_ref, o_ref, acc_ref):
    """One (tm, tn, tk) grid step of the training-mode noisy linear."""
    k = pl.program_id(2)

    @pl.when(k == 0)
    def _():
        acc_ref[...] = jnp.zeros_like(acc_ref)

    # Effective weight tile (tk, tn), noise rebuilt on the VPU from vectors:
    #   W_eff_t = W_mu_t + W_sigma_t * (eps_in[:, None] * eps_out[None, :])
    w_eff = wmu_ref[...] + wsig_ref[...] * (ein_ref[...] * eout_ref[...])

    # MXU: [tm, tk] x [tk, tn] accumulate in f32.
    acc_ref[...] += jnp.dot(x_ref[...], w_eff,
                            preferred_element_type=jnp.float32)

    @pl.when(k == pl.num_programs(2) - 1)
    def _():
        b_eff = bmu_ref[...] + bsig_ref[...] * beps_ref[...]          # (1, tn)
        o_ref[...] = (acc_ref[...] + b_eff).astype(o_ref.dtype)


def _linear_kernel(x_ref, w_ref, b_ref, o_ref, acc_ref):
    """Eval-mode path: y = x @ W_mu_t + b_mu (no sigma/epsilon HBM traffic)."""
    k = pl.program_id(2)

    @pl.when(k == 0)
    def _():
        acc_ref[...] = jnp.zeros_like(acc_ref)

    acc_ref[...] += jnp.dot(x_ref[...], w_ref[...],
                            preferred_element_type=jnp.float32)

    @pl.when(k == pl.num_programs(2) - 1)
    def _():
        o_ref[...] = (acc_ref[...] + b_ref[...]).astype(o_ref.dtype)


# --------------------------------- wrapper ------------------------------------

def _pick_tile(dim, target, base):
    """Largest multiple of `base`, <= target, that divides `dim`; else full dim.

    Falls back to the full dimension when it is not (8,128)-friendly, which is
    always legal for a BlockSpec (block == full array extent).
    """
    if dim % base == 0:
        t = min(target, dim)
        t -= t % base
        while t >= base:
            if dim % t == 0:
                return t
            t -= base
    return dim


def noisy_linear(x, weight_mu_t, weight_sigma_t, eps_in, eps_out,
                 bias_mu, bias_sigma, bias_epsilon, *, training=True,
                 tm_target=256, tn_target=512, tk_target=512):
    """Pallas forward of NoisyLinear.

    x:               (B, in_features)
    weight_mu_t:     (in_features, out_features)   -- pre-transposed storage
    weight_sigma_t:  (in_features, out_features)
    eps_in, eps_out: (in_features,), (out_features,)  factorized noise vectors
    bias_*:          (out_features,)
    Tile targets (256, 512, 512) keep double-buffered f32 tiles well under the
    v7x 32 MiB scoped-VMEM default while being 128/256-aligned for v5e/v6e.
    """
    B, in_f = x.shape
    out_f = weight_mu_t.shape[1]

    tm = _pick_tile(B, tm_target, 8)
    tn = _pick_tile(out_f, tn_target, 128)
    tk = _pick_tile(in_f, tk_target, 128)
    grid = (B // tm, out_f // tn, in_f // tk)

    bmu2 = bias_mu.reshape(1, out_f)
    out_shape = jax.ShapeDtypeStruct((B, out_f), x.dtype)
    cparams = pltpu.CompilerParams(
        dimension_semantics=("parallel", "parallel", "arbitrary"))

    if not training:
        # Inference: mu weights + mu bias only -> ~half the HBM bytes.
        return pl.pallas_call(
            _linear_kernel,
            out_shape=out_shape,
            grid=grid,
            in_specs=[
                pl.BlockSpec((tm, tk), lambda i, j, k: (i, k)),   # x
                pl.BlockSpec((tk, tn), lambda i, j, k: (k, j)),   # W_mu_t
                pl.BlockSpec((1, tn),  lambda i, j, k: (0, j)),   # bias_mu
            ],
            out_specs=pl.BlockSpec((tm, tn), lambda i, j, k: (i, j)),
            scratch_shapes=[pltpu.VMEM((tm, tn), jnp.float32)],
            compiler_params=cparams,
        )(x, weight_mu_t, bmu2)

    ein2 = eps_in.reshape(in_f, 1)      # column vector, sliced along K
    eout2 = eps_out.reshape(1, out_f)   # row vector,    sliced along N
    bsig2 = bias_sigma.reshape(1, out_f)
    beps2 = bias_epsilon.reshape(1, out_f)

    return pl.pallas_call(
        _noisy_linear_kernel,
        out_shape=out_shape,
        grid=grid,
        in_specs=[
            pl.BlockSpec((tm, tk), lambda i, j, k: (i, k)),   # x
            pl.BlockSpec((tk, tn), lambda i, j, k: (k, j)),   # W_mu_t
            pl.BlockSpec((tk, tn), lambda i, j, k: (k, j)),   # W_sigma_t
            pl.BlockSpec((tk, 1),  lambda i, j, k: (k, 0)),   # eps_in
            pl.BlockSpec((1, tn),  lambda i, j, k: (0, j)),   # eps_out
            pl.BlockSpec((1, tn),  lambda i, j, k: (0, j)),   # bias_mu
            pl.BlockSpec((1, tn),  lambda i, j, k: (0, j)),   # bias_sigma
            pl.BlockSpec((1, tn),  lambda i, j, k: (0, j)),   # bias_epsilon
        ],
        out_specs=pl.BlockSpec((tm, tn), lambda i, j, k: (i, j)),
        scratch_shapes=[pltpu.VMEM((tm, tn), jnp.float32)],
        compiler_params=cparams,
    )(x, weight_mu_t, weight_sigma_t, ein2, eout2, bmu2, bsig2, beps2)


# ------------------ deterministic parameter / noise initialization ------------

def _scale_noise(key, size):
    # torch: x.sign() * x.abs().sqrt()
    x = jax.random.normal(key, (size,), dtype=jnp.float32)
    return jnp.sign(x) * jnp.sqrt(jnp.abs(x))


def init_noisy_linear(key, in_features, out_features, std_init=0.5):
    k_wmu, k_bmu, k_ein, k_eout = jax.random.split(key, 4)
    mu_range = 1.0 / math.sqrt(in_features)

    # Weights stored pre-transposed (in_features, out_features): K-major RHS
    # for the MXU, lane-dense output, no in-kernel transposes.
    weight_mu_t = jax.random.uniform(
        k_wmu, (in_features, out_features), jnp.float32, -mu_range, mu_range)
    weight_sigma_t = jnp.full((in_features, out_features),
                              std_init / math.sqrt(in_features), jnp.float32)
    bias_mu = jax.random.uniform(
        k_bmu, (out_features,), jnp.float32, -mu_range, mu_range)
    bias_sigma = jnp.full((out_features,),
                          std_init / math.sqrt(out_features), jnp.float32)

    # Factorized Gaussian noise: keep only the vectors; the (O,I) outer product
    # (weight_epsilon) is reconstructed per-tile inside the kernel.
    eps_in = _scale_noise(k_ein, in_features)
    eps_out = _scale_noise(k_eout, out_features)
    bias_epsilon = eps_out

    return dict(weight_mu_t=weight_mu_t, weight_sigma_t=weight_sigma_t,
                eps_in=eps_in, eps_out=eps_out, bias_mu=bias_mu,
                bias_sigma=bias_sigma, bias_epsilon=bias_epsilon)


if __name__ == "__main__":
    key = jax.random.PRNGKey(0)
    k_params, k_x = jax.random.split(key)

    B, IN_F, OUT_F = 8, 64, 32
    params = init_noisy_linear(k_params, IN_F, OUT_F, std_init=0.5)
    x = jax.random.normal(k_x, (B, IN_F), dtype=jnp.float32)

    # Training-mode forward (noisy weights) through the Pallas kernel.
    y = noisy_linear(x, params["weight_mu_t"], params["weight_sigma_t"],
                     params["eps_in"], params["eps_out"], params["bias_mu"],
                     params["bias_sigma"], params["bias_epsilon"],
                     training=True)
    y = jax.block_until_ready(y)

    # Reference in plain JAX (same math as torch F.linear with
    # W_eff = W_mu + W_sigma * (eps_out ⊗ eps_in)).
    w_eps_t = jnp.outer(params["eps_in"], params["eps_out"])   # = (eps_out ⊗ eps_in)^T
    w_eff_t = params["weight_mu_t"] + params["weight_sigma_t"] * w_eps_t
    b_eff = params["bias_mu"] + params["bias_sigma"] * params["bias_epsilon"]
    y_ref = x @ w_eff_t + b_eff
    assert y.shape == (B, OUT_F)
    assert jnp.allclose(y, y_ref, atol=1e-5, rtol=1e-5)

    # Eval-mode forward (mu weights only, sigma/eps never touched).
    y_eval = noisy_linear(x, params["weight_mu_t"], params["weight_sigma_t"],
                          params["eps_in"], params["eps_out"],
                          params["bias_mu"], params["bias_sigma"],
                          params["bias_epsilon"], training=False)
    y_eval = jax.block_until_ready(y_eval)
    y_eval_ref = x @ params["weight_mu_t"] + params["bias_mu"]
    assert jnp.allclose(y_eval, y_eval_ref, atol=1e-5, rtol=1e-5)

    print("KERNEL_OK")
</pallas_src>

<mosaic_0001>
module attributes {stable_mosaic.version = 11 : i64} {
  func.func @_noisy_linear_kernel(%arg0: i32, %arg1: i32, %arg2: i32, %arg3: memref<8x64xf32, #tpu.memory_space<vmem>>, %arg4: memref<64x32xf32, #tpu.memory_space<vmem>>, %arg5: memref<64x32xf32, #tpu.memory_space<vmem>>, %arg6: memref<64x1xf32, #tpu.memory_space<vmem>>, %arg7: memref<1x32xf32, #tpu.memory_space<vmem>>, %arg8: memref<1x32xf32, #tpu.memory_space<vmem>>, %arg9: memref<1x32xf32, #tpu.memory_space<vmem>>, %arg10: memref<1x32xf32, #tpu.memory_space<vmem>>, %arg11: memref<8x32xf32, #tpu.memory_space<vmem>>, %arg12: memref<8x32xf32, #tpu.memory_space<vmem>>) attributes {dimension_semantics = [#tpu.dimension_semantics<parallel>, #tpu.dimension_semantics<parallel>, #tpu.dimension_semantics<arbitrary>], iteration_bounds = array<i64: 1, 1, 1>, scalar_prefetch = 0 : i64, scratch_operands = 1 : i64, tpu.core_type = #tpu.core_type<tc>, window_params = [{transform_indices = @transform_0, window_bounds = array<i64: 8, 64>}, {transform_indices = @transform_1, window_bounds = array<i64: 64, 32>}, {transform_indices = @transform_2, window_bounds = array<i64: 64, 32>}, {transform_indices = @transform_3, window_bounds = array<i64: 64, 1>}, {transform_indices = @transform_4, window_bounds = array<i64: 1, 32>}, {transform_indices = @transform_5, window_bounds = array<i64: 1, 32>}, {transform_indices = @transform_6, window_bounds = array<i64: 1, 32>}, {transform_indices = @transform_7, window_bounds = array<i64: 1, 32>}, {transform_indices = @transform_8, window_bounds = array<i64: 8, 32>}]} {
    %c0_i32 = arith.constant 0 : i32
    %0 = arith.cmpi eq, %arg2, %c0_i32 : i32
    %1 = arith.extui %0 : i1 to i32
    %c0_i32_0 = arith.constant 0 : i32
    %2 = arith.cmpi ne, %1, %c0_i32_0 : i32
    scf.if %2 {
      %cst_16 = arith.constant 0.000000e+00 : f32
      %20 = vector.broadcast %cst_16 : f32 to vector<8x32xf32>
      %c0_17 = arith.constant 0 : index
      %c0_18 = arith.constant 0 : index
      %21 = vector.load %arg12[%c0_17, %c0_18] : memref<8x32xf32, #tpu.memory_space<vmem>>, vector<8x32xf32>
      tpu.vector_store %arg12[%c0_17, %c0_18], %20 {strides = array<i32>} : memref<8x32xf32, #tpu.memory_space<vmem>>, vector<8x32xf32>,
    } else {
    }
    %c0 = arith.constant 0 : index
    %c0_1 = arith.constant 0 : index
    %3 = vector.load %arg4[%c0, %c0_1] : memref<64x32xf32, #tpu.memory_space<vmem>>, vector<64x32xf32>
    %c0_2 = arith.constant 0 : index
    %c0_3 = arith.constant 0 : index
    %4 = vector.load %arg5[%c0_2, %c0_3] : memref<64x32xf32, #tpu.memory_space<vmem>>, vector<64x32xf32>
    %c0_4 = arith.constant 0 : index
    %c0_5 = arith.constant 0 : index
    %5 = vector.load %arg6[%c0_4, %c0_5] : memref<64x1xf32, #tpu.memory_space<vmem>>, vector<64x1xf32>
    %c0_6 = arith.constant 0 : index
    %c0_7 = arith.constant 0 : index
    %6 = vector.load %arg7[%c0_6, %c0_7] : memref<1x32xf32, #tpu.memory_space<vmem>>, vector<1x32xf32>
    %7 = vector.broadcast %5 : vector<64x1xf32> to vector<64x32xf32>
    %8 = vector.broadcast %6 : vector<1x32xf32> to vector<64x32xf32>
    %9 = arith.mulf %7, %8 : vector<64x32xf32>
    %10 = arith.mulf %4, %9 : vector<64x32xf32>
    %11 = arith.addf %3, %10 : vector<64x32xf32>
    %c0_8 = arith.constant 0 : index
    %c0_9 = arith.constant 0 : index
    %12 = vector.load %arg12[%c0_8, %c0_9] : memref<8x32xf32, #tpu.memory_space<vmem>>, vector<8x32xf32>
    %c0_10 = arith.constant 0 : index
    %c0_11 = arith.constant 0 : index
    %13 = vector.load %arg3[%c0_10, %c0_11] : memref<8x64xf32, #tpu.memory_space<vmem>>, vector<8x64xf32>
    %cst = arith.constant dense<0.000000e+00> : vector<8x32xf32>
    %14 = tpu.matmul %13, %11, %cst {dimension_numbers = #tpu.dot_dimension_numbers<[1], [0], [0], [1], [0, 0, 1, 1], [], []>} : vector<8x64xf32>, vector<64x32xf32>, vector<8x32xf32> -> vector<8x32xf32>
    %15 = arith.addf %12, %14 : vector<8x32xf32>
    %c0_12 = arith.constant 0 : index
    %c0_13 = arith.constant 0 : index
    %16 = vector.load %arg12[%c0_12, %c0_13] : memref<8x32xf32, #tpu.memory_space<vmem>>, vector<8x32xf32>
    tpu.vector_store %arg12[%c0_12, %c0_13], %15 {strides = array<i32>} : memref<8x32xf32, #tpu.memory_space<vmem>>, vector<8x32xf32>,
    %c0_i32_14 = arith.constant 0 : i32
    %17 = arith.cmpi eq, %arg2, %c0_i32_14 : i32
    %18 = arith.extui %17 : i1 to i32
    %c0_i32_15 = arith.constant 0 : i32
    %19 = arith.cmpi ne, %18, %c0_i32_15 : i32
    scf.if %19 {
      %c0_16 = arith.constant 0 : index
      %c0_17 = arith.constant 0 : index
      %20 = vector.load %arg8[%c0_16, %c0_17] : memref<1x32xf32, #tpu.memory_space<vmem>>, vector<1x32xf32>
      %c0_18 = arith.constant 0 : index
      %c0_19 = arith.constant 0 : index
      %21 = vector.load %arg9[%c0_18, %c0_19] : memref<1x32xf32, #tpu.memory_space<vmem>>, vector<1x32xf32>
      %c0_20 = arith.constant 0 : index
      %c0_21 = arith.constant 0 : index
      %22 = vector.load %arg10[%c0_20, %c0_21] : memref<1x32xf32, #tpu.memory_space<vmem>>, vector<1x32xf32>
      %23 = arith.mulf %21, %22 : vector<1x32xf32>
      %24 = arith.addf %20, %23 : vector<1x32xf32>
      %c0_22 = arith.constant 0 : index
      %c0_23 = arith.constant 0 : index
      %25 = vector.load %arg12[%c0_22, %c0_23] : memref<8x32xf32, #tpu.memory_space<vmem>>, vector<8x32xf32>
      %26 = vector.broadcast %24 : vector<1x32xf32> to vector<8x32xf32>
      %27 = arith.addf %25, %26 : vector<8x32xf32>
      %c0_24 = arith.constant 0 : index
      %c0_25 = arith.constant 0 : index
      %28 = vector.load %arg11[%c0_24, %c0_25] : memref<8x32xf32, #tpu.memory_space<vmem>>, vector<8x32xf32>
      tpu.vector_store %arg11[%c0_24, %c0_25], %27 {strides = array<i32>} : memref<8x32xf32, #tpu.memory_space<vmem>>, vector<8x32xf32>,
    } else {
    }
    return
  }
  func.func @transform_0(%arg0: i32, %arg1: i32, %arg2: i32) -> (i32, i32) {
    %c0_i32 = arith.constant 0 : i32
    return %arg0, %arg2 : i32, i32
  }
  func.func @transform_1(%arg0: i32, %arg1: i32, %arg2: i32) -> (i32, i32) {
    %c0_i32 = arith.constant 0 : i32
    return %arg2, %arg1 : i32, i32
  }
  func.func @transform_2(%arg0: i32, %arg1: i32, %arg2: i32) -> (i32, i32) {
    %c0_i32 = arith.constant 0 : i32
    return %arg2, %arg1 : i32, i32
  }
  func.func @transform_3(%arg0: i32, %arg1: i32, %arg2: i32) -> (i32, i32) {
    %c0_i32 = arith.constant 0 : i32
    %c0_i32_0 = arith.constant 0 : i32
    return %arg2, %c0_i32 : i32, i32
  }
  func.func @transform_4(%arg0: i32, %arg1: i32, %arg2: i32) -> (i32, i32) {
    %c0_i32 = arith.constant 0 : i32
    %c0_i32_0 = arith.constant 0 : i32
    return %c0_i32, %arg1 : i32, i32
  }
  func.func @transform_5(%arg0: i32, %arg1: i32, %arg2: i32) -> (i32, i32) {
    %c0_i32 = arith.constant 0 : i32
    %c0_i32_0 = arith.constant 0 : i32
    return %c0_i32, %arg1 : i32, i32
  }
  func.func @transform_6(%arg0: i32, %arg1: i32, %arg2: i32) -> (i32, i32) {
    %c0_i32 = arith.constant 0 : i32
    %c0_i32_0 = arith.constant 0 : i32
    return %c0_i32, %arg1 : i32, i32
  }
  func.func @transform_7(%arg0: i32, %arg1: i32, %arg2: i32) -> (i32, i32) {
    %c0_i32 = arith.constant 0 : i32
    %c0_i32_0 = arith.constant 0 : i32
    return %c0_i32, %arg1 : i32, i32
  }
  func.func @transform_8(%arg0: i32, %arg1: i32, %arg2: i32) -> (i32, i32) {
    %c0_i32 = arith.constant 0 : i32
    return %arg0, %arg1 : i32, i32
  }
}

</mosaic_0001>

<bundles_post_ra>
// kernel: tpu_custom_call.1
= control target key start
LH: loop header
LB: loop body
LE: loop exit
PB: predicated region body
PF: predicated region fallthrough
CT: control target
= control target key end

     0   :  { %v299_v2 = vmov 0   ;;  %v300_v5 = vmov 0.0   ;;  %s451_s0 = inlined_call_operand.vmem [shape: f32[8,64], index: 0, kind: input, shape index: {}]   ;;  %s452_s1 = inlined_call_operand.vmem [shape: f32[64,32], index: 1, kind: input, shape index: {}]   ;;  %s453_s2 = inlined_call_operand.vmem [shape: f32[64,32], index: 2, kind: input, shape index: {}]   ;;  %s454_s3 = inlined_call_operand.vmem [shape: f32[64,1], index: 3, kind: input, shape index: {}]   ;;  %s455_s4 = inlined_call_operand.vmem [shape: f32[1,32], index: 4, kind: input, shape index: {}]   ;;  %s456_s5 = inlined_call_operand.vmem [shape: f32[1,32], index: 5, kind: input, shape index: {}]   ;;  %s457_s6 = inlined_call_operand.vmem [shape: f32[1,32], index: 6, kind: input, shape index: {}]   ;;  %s458_s7 = inlined_call_operand.vmem [shape: f32[1,32], index: 7, kind: input, shape index: {}]   ;;  %s459_s8 = inlined_call_operand.hbm [shape: f32[8,32], index: 8, kind: output, shape index: {}]  }
   0x1   :  { %v59_v0 = vld [vmem:[%s454_s3 + $0x38] sm:$0xff]  ;;  %v57_v1 = vld [vmem:[%s454_s3 + $0x28] sm:$0xff]  ;;  %276 = vset.pattern.permute.xlu1 %v299_v2  ;;  %275 = vset.pattern.permute.xlu0 %v299_v2  ;;  %v58_v3 = vld [vmem:[%s454_s3 + $0x30] sm:$0xff] }
   0x2   :  { %98 = vperm.xlu0 %275, %v59_v0   ;;  %88 = vperm.xlu1 %276, %v57_v1   ;;  %v56_v4 = vld [vmem:[%s454_s3 + $0x20] sm:$0xff] }
   0x3   :  { %252 = vmatprep.subr.mxu0 %v300_v5 }
   0x4   :  { %13 = vsyncpa [#allocation4], 0  ;;  %v55_v6 = vld [vmem:[%s454_s3 + $0x18] sm:$0xff]  ;;  %v54_v7 = vld [vmem:[%s454_s3 + $0x10] sm:$0xff]  ;;  %vm301_vm0 = vmmov 0   ;;  %vm34_vm1 = vcmask 261120   ;;  %v220_v60 = vlaneseq }
   0x5   :  { %v53_v8 = vld [vmem:[%s454_s3 + $0x8] sm:$0xff]  ;;  %v52_v9 = vld [vmem:[%s454_s3] sm:$0xff]  ;;  %268 = vmatprep.mubr.msk.f32.mxu0 %vm301_vm0, %v300_v5  ;;  %35 = vst.msk [vmem:[#allocation2] sm:$0xff] %vm34_vm1, %v300_v5  ;;  %v51_v12 = vld [vmem:[%s453_s2 + $0x38] sm:$0xff]  ;;  %vm133_vm2 = vcmask 523264  }
   0x6   :  { %93 = vperm.xlu0 %275, %v58_v3   ;;  %83 = vperm.xlu1 %276, %v56_v4   ;;  %v241_v10 = vld [vmem:[%s455_s4] ss:$0 sm:$0xff]  ;;  %v43_v15 = vld [vmem:[%s452_s1 + $0x38] sm:$0xff]  ;;  %v49_v18 = vld [vmem:[%s453_s2 + $0x28] sm:$0xff]  ;;  %v221_v1 = vshrl.u32 %v220_v60, 7 }
   0x7   :  { %v50_v20 = vld [vmem:[%s453_s2 + $0x30] sm:$0xff]  ;;  %v48_v25 = vld [vmem:[%s453_s2 + $0x20] sm:$0xff]  ;;  %v47_v30 = vld [vmem:[%s453_s2 + $0x18] sm:$0xff] }
   0x8   :  { %v42_v26 = vld [vmem:[%s452_s1 + $0x30] sm:$0xff]  ;;  %v41_v32 = vld [vmem:[%s452_s1 + $0x28] sm:$0xff]  ;;  %v40_v38 = vld [vmem:[%s452_s1 + $0x20] sm:$0xff] }
   0x9   :  { %v46_v37 = vld [vmem:[%s453_s2 + $0x10] sm:$0xff]  ;;  %v45_v42 = vld [vmem:[%s453_s2 + $0x8] sm:$0xff]  ;;  %v39_v44 = vld [vmem:[%s452_s1 + $0x18] sm:$0xff] }
   0xa   :  { %78 = vperm.xlu0 %275, %v55_v6   ;;  %73 = vperm.xlu1 %276, %v54_v7   ;;  %v44_v49 = vld [vmem:[%s453_s2] sm:$0xff]  ;;  %v38_v50 = vld [vmem:[%s452_s1 + $0x10] sm:$0xff]  ;;  %v37_v53 = vld [vmem:[%s452_s1 + $0x8] sm:$0xff]  ;;  %v222_v7 = vsub.s32 0, %v221_v1 }
   0xb   :  { %v36_v56 = vld [vmem:[%s452_s1] sm:$0xff] }
   0xc   :  { %v132_v59 = vld [vmem:[%s451_s0] sm:$0xff] }
   0xd   :  { %v214_v61 = vld [vmem:[%s457_s6] sm:$0x1]  ;;  %s302_s6 = smov [#allocation3]  }
   0xe   :  { %68 = vperm.xlu0 %275, %v53_v8   ;;  %63 = vperm.xlu1 %276, %v52_v9   ;;  %v215_v62 = vld [vmem:[%s458_s7] sm:$0x1]  ;;  %s233_s12 = sshll.u32 %s302_s6, 4  ;;  %s234_s12 = int_to_ptr.vmem [resolvable:$true] %s233_s12 }
   0xf   :  { %v131_v63 = vld [vmem:[#allocation2] sm:$0xff]  ;;  %v216_v0 = vmul.f32 %v215_v62, %v214_v61  ;;  %s277_s7 = scalar_lea.vmem %s234_s12, 128  ;;  %p282_p1 = scmp.lt.s32.totalorder %s234_s12, %s234_s12 }
  0x10   :  { %v213_v3 = vld [vmem:[%s456_s5] sm:$0x1]  ;;  %p278_p0 = scmp.ne.s32.totalorder %s234_s12, %s277_s7  ;;  %p283_p2 = scmp.lt.s32.totalorder %s277_s7, %s277_s7 }
  0x11   :  { %v217_v6 = vadd.f32 %v216_v0, %v213_v3 }
  0x12   :  { %p284_p3 = por %p283_p2, %p282_p1 }
  0x13   :  { %v223_v8 = vrot.slane %v217_v6, %v222_v7 }
  0x14   :  { %p285_p4 = pnand %p284_p3, %p278_p0 }
  0x7d   :  { %v99_v11 = vpop.permute.xlu0 %98  ;;  %v89_v13 = vpop.permute.xlu1 %88 }
  0x7e   :  { %v114_v14 = vmul.f32 %v241_v10, %v99_v11  ;;  %v112_v17 = vmul.f32 %v241_v10, %v89_v13 }
  0x80   :  { %v122_v16 = vmul.f32 %v114_v14, %v51_v12  ;;  %v120_v27 = vmul.f32 %v112_v17, %v49_v18 }
  0x81   :  { %v94_v19 = vpop.permute.xlu0 %93  ;;  %v84_v21 = vpop.permute.xlu1 %83 }
  0x82   :  { %v113_v22 = vmul.f32 %v241_v10, %v94_v19  ;;  %v111_v23 = vmul.f32 %v241_v10, %v84_v21  ;;  %v130_v24 = vadd.f32 %v122_v16, %v43_v15  ;;  %v128_v40 = vadd.f32 %v120_v27, %v41_v32 }
  0x84   :  { %v121_v28 = vmul.f32 %v113_v22, %v50_v20  ;;  %253 = vmatpush3.msra.mxu0 %v130_v24  ;;  %v119_v33 = vmul.f32 %v111_v23, %v48_v25 }
  0x85   :  { %v79_v29 = vpop.permute.xlu0 %78  ;;  %v74_v31 = vpop.permute.xlu1 %73  ;;  %254 = vmatprep.subr.mxu0 %v300_v5 }
  0x86   :  { %v110_v34 = vmul.f32 %v241_v10, %v79_v29  ;;  %v109_v35 = vmul.f32 %v241_v10, %v74_v31  ;;  %v129_v36 = vadd.f32 %v121_v28, %v42_v26  ;;  %v127_v48 = vadd.f32 %v119_v33, %v40_v38 }
  0x88   :  { %v118_v39 = vmul.f32 %v110_v34, %v47_v30  ;;  %255 = vmatpush3.msra.mxu0 %v129_v36  ;;  %v117_v45 = vmul.f32 %v109_v35, %v46_v37 }
  0x89   :  { %v69_v41 = vpop.permute.xlu0 %68  ;;  %v64_v43 = vpop.permute.xlu1 %63  ;;  %256 = vmatprep.subr.mxu0 %v300_v5 }
  0x8a   :  { %v108_v46 = vmul.f32 %v241_v10, %v69_v41  ;;  %v107_v47 = vmul.f32 %v241_v10, %v64_v43  ;;  %257 = vmatpush3.msra.mxu0 %v128_v40  ;;  %v126_v52 = vadd.f32 %v118_v39, %v39_v44  ;;  %v125_v55 = vadd.f32 %v117_v45, %v38_v50 }
  0x8b   :  { %258 = vmatprep.subr.mxu0 %v300_v5 }
  0x8c   :  { %v116_v51 = vmul.f32 %v108_v46, %v45_v42  ;;  %259 = vmatpush3.msra.mxu0 %v127_v48  ;;  %v115_v54 = vmul.f32 %v107_v47, %v44_v49 }
  0x8d   :  { %260 = vmatprep.subr.mxu0 %v300_v5 }
  0x8e   :  { %261 = vmatpush3.msra.mxu0 %v126_v52  ;;  %v124_v57 = vadd.f32 %v116_v51, %v37_v53  ;;  %v123_v58 = vadd.f32 %v115_v54, %v36_v56 }
  0x8f   :  { %262 = vmatprep.subr.mxu0 %v300_v5 }
  0x90   :  { %263 = vmatpush3.msra.mxu0 %v125_v55 }
  0x91   :  { %264 = vmatprep.subr.mxu0 %v300_v5 }
  0x92   :  { %265 = vmatpush3.msra.mxu0 %v124_v57 }
  0x93   :  { %266 = vmatprep.subr.mxu0 %v300_v5 }
  0x94   :  { %267 = vmatpush3.msra.mxu0 %v123_v58 }
  0x95   :  { %269 = vmatmul.mubr.msk.f32.vlgmr.msra.gmra.mxu0 %vm133_vm2, %v132_v59 }
 0x155   :  { %v203_v2 = vpop.f32.mrf.mxu0 }
 0x156   :  { %v207_v4 = vadd.f32 %v203_v2, %v131_v63 }
 0x157   :  { %v270_v5 = vpop.f32.mrf.mxu0 }
 0x158   :  { %209 = vst.msk [vmem:[#allocation2] sm:$0xff] %vm34_vm1, %v207_v4 }
 0x15f   :  { %v218_v9 = vld [vmem:[#allocation2] sm:$0xff] }
 0x160   :  { %v225_v10 = vadd.f32 %v223_v8, %v218_v9 }
 0x162   :  { %226 = vst.msk [vmem:[#allocation3] sm:$0xff] %vm34_vm1, %v225_v10 }
 0x163   :  { %288 = shalt.err (!%p285_p4)
}
 0x164   :  { %236 = dma.vmem_to_hbm [thread:$0]  %s234_s12, 128, %s459_s8, [#allocation4]  }
 0x165   :  { %297 = dma.done.wait [#allocation4], 128  }
 0x166   :  { %298 = vsyncadd [#allocation4], 4294967168 }
 0x167   :  { %240 = vsyncpa [#allocation4], 1 }

</bundles_post_ra>
